<compile_context>
chip_gen: v6e
topology: v6e:2x2x1
jax: 0.10.0
libtpu: 0.0.40
codegen_flags: <defaults>
</compile_context>

<pallas_src>
import math

import jax
import jax.numpy as jnp
from jax.experimental import pallas as pl
from jax.experimental.pallas import tpu as pltpu


def _gaussian_sample_kernel(mean_ref, std_ref, eps_ref, out_ref):
    # Pure elementwise hot path: samples = mean + eps * std.
    # mean/std are resident (1, d_hw) rows broadcast over the (tr, d_hw) tile.
    out_ref[...] = mean_ref[...] + eps_ref[...] * std_ref[...]


def _round_up(x, m):
    return (x + m - 1) // m * m


def gaussian_distributions_forward(mean, log_std, eps, *,
                                   max_tile_rows=8192,
                                   target_block_bytes=4 * 1024 * 1024,
                                   small_input_elems=32 * 1024):
    """mean, log_std: (D,); eps: (N, D). Returns mean + eps * exp(log_std)."""
    n, d = eps.shape
    dtype = eps.dtype
    itemsize = jnp.dtype(dtype).itemsize

    # Precompute std once on the host/XLA side (tiny (D,) vector).
    mean = mean.astype(dtype)
    std = jnp.exp(log_std).astype(dtype)

    # Tiny problems: pallas_call fixed launch/pipeline overhead dominates;
    # XLA's fused elementwise is strictly better there.
    if n * d < small_input_elems:
        return mean[None, :] + eps * std[None, :]

    # ---- lane-dense folding WITHOUT host-side pad copies.
    # Pack `fold` logical rows into one 128-wide hardware row; fold is chosen to
    # divide N exactly so eps is only reshaped (free), never padded (full copy).
    if d % 128 == 0:
        fold = 1                            # already lane-dense
    elif 128 % d == 0:
        fold = math.gcd(128 // d, n)        # largest fold dividing N
    else:
        fold = 1  # TODO(synk): lane-pad arbitrary D to a multiple of 128.
    d_hw = d * fold
    n_hw = n // fold

    eps_hw = eps.reshape(n_hw, d_hw)
    mean_hw = jnp.tile(mean.reshape(1, d), (1, fold))
    std_hw = jnp.tile(std.reshape(1, d), (1, fold))

    # ---- row tile: multiple of the dtype's sublane packing, sized for
    # ~target_block_bytes so the DMA pipeline reaches the HBM roofline instead
    # of being per-grid-step-overhead bound.
    sublane = max(8, 32 // itemsize)        # 8 for f32, 16 for bf16, 32 for 8-bit
    bytes_per_row = d_hw * itemsize
    tr = (target_block_bytes // bytes_per_row) // sublane * sublane
    tr = max(sublane, min(max_tile_rows, tr))
    # Guarantee >=2 grid steps so dimension_semantics=("parallel",) actually
    # lets v7x shard the row axis across its 2 TensorCores.
    tr = min(tr, max(sublane, _round_up((n_hw + 1) // 2, sublane)))
    # Don't exceed the (rounded-up) problem size for modest inputs.
    tr = min(tr, max(sublane, _round_up(n_hw, sublane)))

    # No host-side padding of n_hw: Pallas masks the ragged last block
    # (reads padded, writes masked), so eps/out are streamed exactly once.
    grid = (pl.cdiv(n_hw, tr),)

    out_hw = pl.pallas_call(
        _gaussian_sample_kernel,
        out_shape=jax.ShapeDtypeStruct((n_hw, d_hw), dtype),
        grid=grid,
        in_specs=[
            pl.BlockSpec((1, d_hw), lambda i: (0, 0)),    # mean (resident)
            pl.BlockSpec((1, d_hw), lambda i: (0, 0)),    # std  (resident)
            pl.BlockSpec((tr, d_hw), lambda i: (i, 0)),   # eps row tile
        ],
        out_specs=pl.BlockSpec((tr, d_hw), lambda i: (i, 0)),
        compiler_params=pltpu.CompilerParams(
            dimension_semantics=("parallel",),            # megacore shard (v7x)
            vmem_limit_bytes=32 * 1024 * 1024,            # safe on v5e..v7x
        ),
    )(mean_hw, std_hw, eps_hw)

    # Row-major (n_hw, d*fold) -> (n, d) is a layout-preserving (free) reshape.
    return out_hw.reshape(n, d)


if __name__ == "__main__":
    embedding_dim = 32
    num_samples = 8

    key = jax.random.PRNGKey(0)
    k_mean, k_logstd, k_eps, k_eps2 = jax.random.split(key, 4)

    # Deterministic parameter init mirroring torch.randn / torch.zeros.
    mean = jax.random.normal(k_mean, (embedding_dim,), dtype=jnp.float32)
    log_std = jnp.zeros((embedding_dim,), dtype=jnp.float32)

    # eps ~ N(0, 1) of shape (num_samples, embedding_dim), as in forward().
    eps = jax.random.normal(k_eps, (num_samples, embedding_dim),
                            dtype=jnp.float32)

    samples = jax.block_until_ready(
        gaussian_distributions_forward(mean, log_std, eps))
    ref = mean[None, :] + eps * jnp.exp(log_std)[None, :]
    assert samples.shape == (num_samples, embedding_dim)
    assert jnp.allclose(samples, ref, atol=1e-5, rtol=1e-5)

    # Larger run that exercises the tiled, pipelined Pallas path
    # (multi-step "parallel" grid, lane-folded rows, nonzero log_std).
    n_big = 8192
    log_std_big = 0.1 * jax.random.normal(k_logstd, (embedding_dim,),
                                          dtype=jnp.float32)
    eps_big = jax.random.normal(k_eps2, (n_big, embedding_dim),
                                dtype=jnp.float32)
    samples_big = jax.block_until_ready(
        gaussian_distributions_forward(mean, log_std_big, eps_big))
    ref_big = mean[None, :] + eps_big * jnp.exp(log_std_big)[None, :]
    assert samples_big.shape == (n_big, embedding_dim)
    assert jnp.allclose(samples_big, ref_big, atol=1e-5, rtol=1e-5)

    print("KERNEL_OK")
</pallas_src>

<mosaic_0001>
module attributes {stable_mosaic.version = 11 : i64} {
  func.func @_gaussian_sample_kernel(%arg0: i32, %arg1: memref<1x128xf32, #tpu.memory_space<vmem>>, %arg2: memref<1x128xf32, #tpu.memory_space<vmem>>, %arg3: memref<1024x128xf32, #tpu.memory_space<vmem>>, %arg4: memref<1024x128xf32, #tpu.memory_space<vmem>>) attributes {dimension_semantics = [#tpu.dimension_semantics<parallel>], iteration_bounds = array<i64: 2>, scalar_prefetch = 0 : i64, scratch_operands = 0 : i64, tpu.core_type = #tpu.core_type<tc>, window_params = [{pipeline_mode = #tpu.pipeline_mode<synchronous>, transform_indices = @transform_0, window_bounds = array<i64: 1, 128>}, {pipeline_mode = #tpu.pipeline_mode<synchronous>, transform_indices = @transform_1, window_bounds = array<i64: 1, 128>}, {transform_indices = @transform_2, window_bounds = array<i64: 1024, 128>}, {transform_indices = @transform_3, window_bounds = array<i64: 1024, 128>}]} {
    %c0 = arith.constant 0 : index
    %c0_0 = arith.constant 0 : index
    %0 = vector.load %arg1[%c0, %c0_0] : memref<1x128xf32, #tpu.memory_space<vmem>>, vector<1x128xf32>
    %c0_1 = arith.constant 0 : index
    %c0_2 = arith.constant 0 : index
    %1 = vector.load %arg3[%c0_1, %c0_2] : memref<1024x128xf32, #tpu.memory_space<vmem>>, vector<1024x128xf32>
    %c0_3 = arith.constant 0 : index
    %c0_4 = arith.constant 0 : index
    %2 = vector.load %arg2[%c0_3, %c0_4] : memref<1x128xf32, #tpu.memory_space<vmem>>, vector<1x128xf32>
    %3 = vector.broadcast %2 : vector<1x128xf32> to vector<1024x128xf32>
    %4 = arith.mulf %1, %3 : vector<1024x128xf32>
    %5 = vector.broadcast %0 : vector<1x128xf32> to vector<1024x128xf32>
    %6 = arith.addf %5, %4 : vector<1024x128xf32>
    %c0_5 = arith.constant 0 : index
    %c0_6 = arith.constant 0 : index
    %7 = vector.load %arg4[%c0_5, %c0_6] : memref<1024x128xf32, #tpu.memory_space<vmem>>, vector<1024x128xf32>
    tpu.vector_store %arg4[%c0_5, %c0_6], %6 {strides = array<i32>} : memref<1024x128xf32, #tpu.memory_space<vmem>>, vector<1024x128xf32>,
    return
  }
  func.func @transform_0(%arg0: i32) -> (i32, i32) {
    %c0_i32 = arith.constant 0 : i32
    %c0_i32_0 = arith.constant 0 : i32
    %c0_i32_1 = arith.constant 0 : i32
    return %c0_i32, %c0_i32_0 : i32, i32
  }
  func.func @transform_1(%arg0: i32) -> (i32, i32) {
    %c0_i32 = arith.constant 0 : i32
    %c0_i32_0 = arith.constant 0 : i32
    %c0_i32_1 = arith.constant 0 : i32
    return %c0_i32, %c0_i32_0 : i32, i32
  }
  func.func @transform_2(%arg0: i32) -> (i32, i32) {
    %c0_i32 = arith.constant 0 : i32
    %c0_i32_0 = arith.constant 0 : i32
    return %arg0, %c0_i32 : i32, i32
  }
  func.func @transform_3(%arg0: i32) -> (i32, i32) {
    %c0_i32 = arith.constant 0 : i32
    %c0_i32_0 = arith.constant 0 : i32
    return %arg0, %c0_i32 : i32, i32
  }
}

</mosaic_0001>

<bundles_post_ra>
// kernel: tpu_custom_call.1
= control target key start
LH: loop header
LB: loop body
LE: loop exit
PB: predicated region body
PF: predicated region fallthrough
CT: control target
= control target key end

     0   :  { %8 = vsyncpa [#allocation3], 0  ;;  %s1770_s0 = inlined_call_operand.hbm [shape: f32[1,128], index: 0, kind: input, shape index: {}]   ;;  %s1771_s1 = inlined_call_operand.vmem [shape: f32[1,128], index: 1, kind: input, shape index: {}]   ;;  %s1772_s2 = inlined_call_operand.hbm [shape: f32[2048,128], index: 2, kind: input, shape index: {}]   ;;  %s1773_s3 = inlined_call_operand.hbm [shape: f32[2048,128], index: 3, kind: output, shape index: {}]  }
   0x1   :  { %9 = vsyncpa [#allocation6], 0 }
   0x2   :  { %11 = vsyncpa [#allocation6 + $0x1], 0 }
   0x3   :  { %12 = vsyncpa [#allocation4], 0 }
   0x4   :  { %14 = vsyncpa [#allocation4 + $0x1], 0  ;;  %s1062_s12 = smov 0   ;;  %s1064_s13 = smov 0  }
   0x5   :  { %s1066_s14 = smov 0   ;;  %s1068_s15 = smov 0  }
   0x6 LB: > { %s1083_s16 = sadd.s32 4294967295, %s1033_s15   ;;  %s829_s17 = sadd.s32 4294967294, %s1033_s15   ;;  %s1033_s15 = sphi %s1068_s15, %s1796_s15   ;;  %s1029_s14 = sphi %s1066_s14, %s1795_s14   ;;  %s1025_s13 = sphi %s1064_s13, %s1794_s13   ;;  %s1021_s12 = sphi %s1062_s12, %s1793_s12  }
   0x7   : > { %s1087_s18 = sadd.s32 1, %s1033_s15   ;;  %s69_s19 = sadd.s32 1, %s1029_s14 }
   0x8   : > { %s66_s20 = ssub.s32 %s1033_s15, %s1087_s18  ;;  %p76_p0 = scmp.ne.s32.totalorder %s1029_s14, %s1025_s13 }
   0x9   : > { %p67_p1 = scmp.eq.s32.totalorder %s66_s20, 0  ;;  %p77_p2 = scmp.eq.s32.totalorder %s1033_s15, 0 }
   0xa   : > { %p82_p3 = scmp.ne.s32.totalorder %s1025_s13, %s1021_s12  ;;  %p1774_p4 = scmp.eq.s32.totalorder %s1083_s16, 0 }
   0xb   : > { %s1099_s21 = scalar_select %p67_p1, %s1029_s14, %s69_s19  }
   0xc   : > { %p1101_p5 = por %p77_p2, %p76_p0  ;;  %p1107_p6 = por %p1774_p4, %p82_p3 }
   0xd   : > { %p106_p7 = scmp.eq.s32.totalorder %s1083_s16, 1  ;;  %p112_p8 = scmp.eq.s32.totalorder %s829_s17, 1 }
   0xe   : > { %s1779_s23 = scalar_select %p1107_p6, 1, 0 }
   0xf   : > { %p830_p9 = scmp.ge.s32.totalorder %s1033_s15, 1  ;;  %p119_p10 = scmp.lt.s32.totalorder %s1033_s15, 3 }
  0x10   : > { %p1114_p11 = por %p106_p7, %p76_p0  ;;  %p1118_p12 = por %p112_p8, %p82_p3 }
  0x11   : > { %p1122_p13 = pnand %p830_p9, %p119_p10  ;;  %s1035_s27 = smov [#allocation2]  }
  0x12   : > { %s1780_s24 = scalar_select %p1114_p11, 1, 0 }
  0x13   : > { %s1781_s25 = scalar_select %p1118_p12, 1, 0 }
  0x14   : > { %s1782_s26 = scalar_select %p1122_p13, 1, 0 }
  0x15   : > { %p857_p2 = pneg %p1122_p13  ;;  %s132_s28 = sshll.u32 %s1035_s27, 4  ;;  %s133_s28 = int_to_ptr.vmem [resolvable:$true] %s132_s28 }
  0x16   : > { %p870_p4 = scmp.lt.s32.totalorder %s1033_s15, 2  ;;  %p1783_p0 = scmp.eq.s32.totalorder %s1083_s16, 0 }
  0x17   : > { %s146_s30 = sand.u32 1, %s1029_s14   ;;  %s922_s6 = scalar_lea.vmem %s133_s28, 16 }
  0x18   : > { %p1132_p7 = pnand %p857_p2, %p1783_p0  ;;  %p1139_p3 = pnand %p870_p4, %p1101_p5 }
  0x19   : > { %s833_s5 = sshll.u32 %s146_s30, 10  ;;  %p923_p9 = scmp.ne.s32.totalorder %s133_s28, %s922_s6 }
  0x1a   : > { %p913_p8 = pneg %p1132_p7  ;;  %s929_s7 = scalar_lea.vmem %s133_s28, 32 }
  0x1b   : > { %p930_p12 = scmp.lt.s32.totalorder %s133_s28, %s133_s28  ;;  %p931_p2 = scmp.lt.s32.totalorder %s929_s7, %s922_s6 }
  0x1c   : > { %p925_p10 = pnand %p923_p9, %p913_p8 }
  0x1d   : > { %p932_p0 = por %p931_p2, %p930_p12 }
  0x1e   : > { %p926_p1 = pneg %p925_p10 }
  0x20   : > { %p933_p11 = pnand %p932_p0, %p926_p1 }
  0x22   : > { %936 = shalt.err (!%p933_p11)
}
  0x23   : > { %860 = dma.hbm_to_vmem [thread:$0]  (!%p1132_p7), %s1770_s0, 16, %s133_s28, [#allocation3]  }
  0x24   : > { %s847_s10 = sshll.u32 %s1033_s15, 14  ;;  %s150_s11 = scalar_lea.vmem [#allocation5], %s833_s5 }
  0x25   : > { %s157_s17 = sshll.u32 %s150_s11, 4  ;;  %s1154_s22 = scalar_lea.hbm %s1772_s2, %s847_s10  ;;  %s1156_s17 = int_to_ptr.vmem [resolvable:$true] %s157_s17 }
  0x26   : > { %s1158_s27 = scalar_lea.sflag [#allocation6], %s146_s30  ;;  %s937_s29 = scalar_lea.hbm %s1154_s22, 16384 }
  0x27   : > { %p938_p4 = scmp.ne.s32.totalorder %s1154_s22, %s937_s29  ;;  %p939_p5 = pneg %p1139_p3 }
  0x28   : > { %s942_s6 = scalar_lea.hbm %s1772_s2, 32768  ;;  %p943_p1 = scmp.lt.s32.totalorder %s1154_s22, %s1772_s2 }
  0x29   : > { %p940_p11 = pnand %p939_p5, %p938_p4  ;;  %p944_p7 = scmp.lt.s32.totalorder %s942_s6, %s937_s29 }
  0x2b   : > { %p941_p12 = pneg %p940_p11  ;;  %p945_p8 = por %p944_p7, %p943_p1 }
  0x2d   : > { %p946_p9 = pnand %p945_p8, %p941_p12 }
  0x2f   : > { %949 = shalt.err (!%p946_p9)
}
  0x30   : > { %s950_s30 = scalar_lea.vmem %s1156_s17, 16384  ;;  %s1036_s9 = smov [#allocation5]  }
  0x31   : > { %p951_p10 = scmp.ne.s32.totalorder %s1156_s17, %s950_s30  ;;  %s955_s10 = sshll.u32 %s1036_s9, 4  ;;  %s956_s10 = int_to_ptr.vmem [resolvable:$false] %s955_s10 }
  0x32   : > { %s957_s11 = scalar_lea.vmem %s956_s10, 32768  ;;  %p958_p4 = scmp.lt.s32.totalorder %s1156_s17, %s956_s10 }
  0x33   : > { %p953_p2 = pnand %p951_p10, %p939_p5  ;;  %p959_p11 = scmp.lt.s32.totalorder %s957_s11, %s950_s30 }
  0x35   : > { %p954_p0 = pneg %p953_p2  ;;  %p960_p6 = por %p959_p11, %p958_p4 }
  0x37   : > { %p961_p13 = pnand %p960_p6, %p954_p0 }
  0x39   : > { %964 = shalt.err (!%p961_p13)
}
  0x3a   : > { %s1037_s19 = smov 128   ;;  %s1038_s20 = smov 8  }
  0x3b   : > { %864 = dma.hbm_to_vmem [thread:$0]  (!%p1139_p3), %s1154_s22, 16384, %s1156_s17, %s1158_s27, %s1037_s19, %s1037_s19, %s1038_s20  }
  0x3c   : > { %p1786_p5 = scmp.ne.s32.totalorder %s1782_s26, 0 }
  0x3d   : > { %p1787_p12 = scmp.eq.s32.totalorder (!%p1786_p5), %s1083_s16, 0 }
  0x3e   : > { %169 = sbr.rel (%p1786_p5) target bundleno = 167 (0xa7), region = 32 }
  0x43   : > { %1008 = dma.done.wait (%p1787_p12), [#allocation3], 16   ;;  %p1788_p1 = pmov %p1787_p12 }
  0x44   : > { %s1186_s29 = sand.u32 1, %s1025_s13   ;;  %p1789_p6 = scmp.ne.s32.totalorder %s1779_s23, 0 }
  0x45   : > { %1010 = vsyncadd (%p1788_p1), [#allocation3], 4294967280  ;;  %s838_s28 = sshll.u32 %s1186_s29, 10  ;;  %s176_s5 = scalar_lea.sflag [#allocation6], %s1186_s29 }
  0x46   : > { %s1192_s4 = scalar_lea.vmem [#allocation5], %s838_s28 }
  0x47   : > { %1012 = dma.done.wait (%p1789_p6), %s176_s5, 16384  }
  0x48   : > { %1014 = vsyncadd (%p1789_p6), %s176_s5, 4294950912  ;;  %v1198_v0 = vld [vmem:[#allocation2] ss:$0 sm:$0xff]  ;;  %v205_v1 = vld [vmem:[%s1192_s4] sm:$0xff]  ;;  %s1232_s23 = scalar_lea.vmem [#allocation7], %s838_s28  ;;  %s848_s22 = sshll.u32 %s1083_s16, 14 }
  0x49   : > { %v1204_v2 = vld [vmem:[%s1771_s1] ss:$0 sm:$0xff]  ;;  %v206_v4 = vld [vmem:[%s1192_s4 + $0x8] sm:$0xff]  ;;  %v207_v5 = vld [vmem:[%s1192_s4 + $0x10] sm:$0xff]  ;;  %s744_s27 = sshll.u32 %s1232_s23, 4  ;;  %s1718_s7 = scalar_lea.hbm %s1773_s3, %s848_s22  ;;  %s1720_s27 = int_to_ptr.vmem [resolvable:$true] %s744_s27 }
  0x4a   : > { %v340_v3 = vmul.f32 %v1204_v2, %v205_v1  ;;  %v208_v6 = vld [vmem:[%s1192_s4 + $0x18] sm:$0xff]  ;;  %v341_v7 = vmul.f32 %v1204_v2, %v206_v4  ;;  %v342_v8 = vmul.f32 %v1204_v2, %v207_v5  ;;  %v209_v10 = vld [vmem:[%s1192_s4 + $0x20] sm:$0xff]  ;;  %v210_v11 = vld [vmem:[%s1192_s4 + $0x28] sm:$0xff]  ;;  %s731_s8 = scalar_lea.sflag [#allocation4], %s1186_s29  ;;  %s965_s30 = scalar_lea.vmem %s1720_s27, 16384 }
  0x4b   : > { %v343_v9 = vmul.f32 %v1204_v2, %v208_v6  ;;  %v211_v12 = vld [vmem:[%s1192_s4 + $0x30] sm:$0xff]  ;;  %v344_v14 = vmul.f32 %v1204_v2, %v209_v10  ;;  %v345_v15 = vmul.f32 %v1204_v2, %v210_v11  ;;  %v212_v17 = vld [vmem:[%s1192_s4 + $0x38] sm:$0xff]  ;;  %v213_v18 = vld [vmem:[%s1192_s4 + $0x40] sm:$0xff]  ;;  %p966_p13 = scmp.ne.s32.totalorder %s1720_s27, %s965_s30  ;;  %p1790_p3 = scmp.ne.s32.totalorder %s1780_s24, 0 }
  0x4c   : > { %v474_v13 = vadd.f32 %v1198_v0, %v340_v3  ;;  %v346_v16 = vmul.f32 %v1204_v2, %v211_v12  ;;  %v214_v19 = vld [vmem:[%s1192_s4 + $0x48] sm:$0xff]  ;;  %v475_v20 = vadd.f32 %v1198_v0, %v341_v7  ;;  %v476_v21 = vadd.f32 %v1198_v0, %v342_v8  ;;  %v215_v24 = vld [vmem:[%s1192_s4 + $0x50] sm:$0xff]  ;;  %v216_v25 = vld [vmem:[%s1192_s4 + $0x58] sm:$0xff]  ;;  %s1039_s9 = smov [#allocation7]  }
  0x4d   : > { %v477_v22 = vadd.f32 %v1198_v0, %v343_v9  ;;  %v347_v23 = vmul.f32 %v1204_v2, %v212_v17  ;;  %v217_v26 = vld [vmem:[%s1192_s4 + $0x60] sm:$0xff]  ;;  %v478_v27 = vadd.f32 %v1198_v0, %v344_v14  ;;  %v479_v28 = vadd.f32 %v1198_v0, %v345_v15  ;;  %v218_v31 = vld [vmem:[%s1192_s4 + $0x68] sm:$0xff]  ;;  %v219_v32 = vld [vmem:[%s1192_s4 + $0x70] sm:$0xff]  ;;  %p967_p7 = pnand %p966_p13, %p1790_p3  ;;  %s969_s10 = sshll.u32 %s1039_s9, 4  ;;  %s970_s10 = int_to_ptr.vmem [resolvable:$false] %s969_s10 }
  0x4e   : > { %602 = vst [vmem:[%s1232_s23] sm:$0xff] %v474_v13  ;;  %v480_v29 = vadd.f32 %v1198_v0, %v346_v16  ;;  %v348_v30 = vmul.f32 %v1204_v2, %v213_v18  ;;  %v220_v33 = vld [vmem:[%s1192_s4 + $0x78] sm:$0xff]  ;;  %603 = vst [vmem:[%s1232_s23 + $0x8] sm:$0xff] %v475_v20  ;;  %v349_v35 = vmul.f32 %v1204_v2, %v214_v19  ;;  %v221_v38 = vld [vmem:[%s1192_s4 + $0x80] sm:$0xff]  ;;  %s971_s11 = scalar_lea.vmem %s970_s10, 32768  ;;  %p972_p9 = scmp.lt.s32.totalorder %s1720_s27, %s970_s10 }
  0x4f   : > { %604 = vst [vmem:[%s1232_s23 + $0x10] sm:$0xff] %v476_v21  ;;  %605 = vst [vmem:[%s1232_s23 + $0x18] sm:$0xff] %v477_v22  ;;  %v481_v34 = vadd.f32 %v1198_v0, %v347_v23  ;;  %v350_v36 = vmul.f32 %v1204_v2, %v215_v24  ;;  %v351_v37 = vmul.f32 %v1204_v2, %v216_v25  ;;  %v222_v43 = vld [vmem:[%s1192_s4 + $0x88] sm:$0xff]  ;;  %v223_v44 = vld [vmem:[%s1192_s4 + $0x90] sm:$0xff]  ;;  %p968_p8 = pneg %p967_p7  ;;  %p973_p10 = scmp.lt.s32.totalorder %s971_s11, %s965_s30 }
  0x50   : > { %606 = vst [vmem:[%s1232_s23 + $0x20] sm:$0xff] %v478_v27  ;;  %607 = vst [vmem:[%s1232_s23 + $0x28] sm:$0xff] %v479_v28  ;;  %v482_v39 = vadd.f32 %v1198_v0, %v348_v30  ;;  %v352_v40 = vmul.f32 %v1204_v2, %v217_v26  ;;  %v353_v41 = vmul.f32 %v1204_v2, %v218_v31  ;;  %v224_v45 = vld [vmem:[%s1192_s4 + $0x98] sm:$0xff]  ;;  %v225_v50 = vld [vmem:[%s1192_s4 + $0xa0] sm:$0xff] }
  0x51   : > { %608 = vst [vmem:[%s1232_s23 + $0x30] sm:$0xff] %v480_v29  ;;  %v354_v42 = vmul.f32 %v1204_v2, %v219_v32  ;;  %609 = vst [vmem:[%s1232_s23 + $0x38] sm:$0xff] %v481_v34  ;;  %v483_v46 = vadd.f32 %v1198_v0, %v349_v35  ;;  %v484_v47 = vadd.f32 %v1198_v0, %v350_v36  ;;  %v226_v51 = vld [vmem:[%s1192_s4 + $0xa8] sm:$0xff]  ;;  %v227_v52 = vld [vmem:[%s1192_s4 + $0xb0] sm:$0xff]  ;;  %p974_p2 = por %p973_p10, %p972_p9 }
  0x52   : > { %v485_v48 = vadd.f32 %v1198_v0, %v351_v37  ;;  %v355_v49 = vmul.f32 %v1204_v2, %v220_v33  ;;  %610 = vst [vmem:[%s1232_s23 + $0x40] sm:$0xff] %v482_v39  ;;  %v486_v53 = vadd.f32 %v1198_v0, %v352_v40  ;;  %v487_v54 = vadd.f32 %v1198_v0, %v353_v41  ;;  %v228_v57 = vld [vmem:[%s1192_s4 + $0xb8] sm:$0xff]  ;;  %v229_v62 = vld [vmem:[%s1192_s4 + $0xc0] sm:$0xff]  ;;  %v230_v5 = vld [vmem:[%s1192_s4 + $0xc8] sm:$0xff] }
  0x53   : > { %v488_v55 = vadd.f32 %v1198_v0, %v354_v42  ;;  %v356_v56 = vmul.f32 %v1204_v2, %v221_v38  ;;  %611 = vst [vmem:[%s1232_s23 + $0x48] sm:$0xff] %v483_v46  ;;  %612 = vst [vmem:[%s1232_s23 + $0x50] sm:$0xff] %v484_v47  ;;  %v357_v59 = vmul.f32 %v1204_v2, %v222_v43  ;;  %v231_v6 = vld [vmem:[%s1192_s4 + $0xd0] sm:$0xff]  ;;  %v232_v7 = vld [vmem:[%s1192_s4 + $0xd8] sm:$0xff]  ;;  %p975_p0 = pnand %p974_p2, %p968_p8 }
  0x54   : > { %613 = vst [vmem:[%s1232_s23 + $0x58] sm:$0xff] %v485_v48  ;;  %v489_v58 = vadd.f32 %v1198_v0, %v355_v49  ;;  %v358_v60 = vmul.f32 %v1204_v2, %v223_v44  ;;  %v359_v61 = vmul.f32 %v1204_v2, %v224_v45  ;;  %614 = vst [vmem:[%s1232_s23 + $0x60] sm:$0xff] %v486_v53  ;;  %v233_v12 = vld [vmem:[%s1192_s4 + $0xe0] sm:$0xff]  ;;  %v234_v13 = vld [vmem:[%s1192_s4 + $0xe8] sm:$0xff] }
  0x55   : > { %615 = vst [vmem:[%s1232_s23 + $0x68] sm:$0xff] %v487_v54  ;;  %616 = vst [vmem:[%s1232_s23 + $0x70] sm:$0xff] %v488_v55  ;;  %v490_v63 = vadd.f32 %v1198_v0, %v356_v56  ;;  %v360_v1 = vmul.f32 %v1204_v2, %v225_v50  ;;  %v361_v3 = vmul.f32 %v1204_v2, %v226_v51  ;;  %v235_v14 = vld [vmem:[%s1192_s4 + $0xf0] sm:$0xff]  ;;  %v236_v19 = vld [vmem:[%s1192_s4 + $0xf8] sm:$0xff] }
  0x56   : > { %v362_v4 = vmul.f32 %v1204_v2, %v227_v52  ;;  %617 = vst [vmem:[%s1232_s23 + $0x78] sm:$0xff] %v489_v58  ;;  %v491_v8 = vadd.f32 %v1198_v0, %v357_v59  ;;  %v492_v9 = vadd.f32 %v1198_v0, %v358_v60  ;;  %v493_v10 = vadd.f32 %v1198_v0, %v359_v61  ;;  %v237_v24 = vld [vmem:[%s1192_s4 + $0x100] sm:$0xff]  ;;  %v238_v29 = vld [vmem:[%s1192_s4 + $0x108] sm:$0xff]  ;;  %v239_v30 = vld [vmem:[%s1192_s4 + $0x110] sm:$0xff] }
  0x57   : > { %v363_v11 = vmul.f32 %v1204_v2, %v228_v57  ;;  %618 = vst [vmem:[%s1232_s23 + $0x80] sm:$0xff] %v490_v63  ;;  %v494_v15 = vadd.f32 %v1198_v0, %v360_v1  ;;  %v495_v16 = vadd.f32 %v1198_v0, %v361_v3  ;;  %v364_v18 = vmul.f32 %v1204_v2, %v229_v62  ;;  %v240_v31 = vld [vmem:[%s1192_s4 + $0x118] sm:$0xff]  ;;  %v241_v36 = vld [vmem:[%s1192_s4 + $0x120] sm:$0xff]  ;;  %v242_v37 = vld [vmem:[%s1192_s4 + $0x128] sm:$0xff] }
  0x58   : > { %v496_v17 = vadd.f32 %v1198_v0, %v362_v4  ;;  %619 = vst [vmem:[%s1232_s23 + $0x88] sm:$0xff] %v491_v8  ;;  %620 = vst [vmem:[%s1232_s23 + $0x90] sm:$0xff] %v492_v9  ;;  %v365_v21 = vmul.f32 %v1204_v2, %v230_v5  ;;  %v366_v22 = vmul.f32 %v1204_v2, %v231_v6  ;;  %v243_v38 = vld [vmem:[%s1192_s4 + $0x130] sm:$0xff]  ;;  %v244_v43 = vld [vmem:[%s1192_s4 + $0x138] sm:$0xff] }
  0x59   : > { %621 = vst [vmem:[%s1232_s23 + $0x98] sm:$0xff] %v493_v10  ;;  %v497_v20 = vadd.f32 %v1198_v0, %v363_v11  ;;  %v367_v23 = vmul.f32 %v1204_v2, %v232_v7  ;;  %622 = vst [vmem:[%s1232_s23 + $0xa0] sm:$0xff] %v494_v15  ;;  %v498_v25 = vadd.f32 %v1198_v0, %v364_v18  ;;  %v245_v48 = vld [vmem:[%s1192_s4 + $0x140] sm:$0xff]  ;;  %v246_v53 = vld [vmem:[%s1192_s4 + $0x148] sm:$0xff] }
  0x5a   : > { %623 = vst [vmem:[%s1232_s23 + $0xa8] sm:$0xff] %v495_v16  ;;  %624 = vst [vmem:[%s1232_s23 + $0xb0] sm:$0xff] %v496_v17  ;;  %v368_v26 = vmul.f32 %v1204_v2, %v233_v12  ;;  %v369_v27 = vmul.f32 %v1204_v2, %v234_v13  ;;  %v370_v28 = vmul.f32 %v1204_v2, %v235_v14  ;;  %v247_v54 = vld [vmem:[%s1192_s4 + $0x150] sm:$0xff]  ;;  %v248_v55 = vld [vmem:[%s1192_s4 + $0x158] sm:$0xff] }
  0x5b   : > { %625 = vst [vmem:[%s1232_s23 + $0xb8] sm:$0xff] %v497_v20  ;;  %v499_v32 = vadd.f32 %v1198_v0, %v365_v21  ;;  %v500_v33 = vadd.f32 %v1198_v0, %v366_v22  ;;  %v501_v34 = vadd.f32 %v1198_v0, %v367_v23  ;;  %v371_v35 = vmul.f32 %v1204_v2, %v236_v19  ;;  %v249_v60 = vld [vmem:[%s1192_s4 + $0x160] sm:$0xff]  ;;  %v250_v61 = vld [vmem:[%s1192_s4 + $0x168] sm:$0xff]  ;;  %v251_v62 = vld [vmem:[%s1192_s4 + $0x170] sm:$0xff] }
  0x5c   : > { %626 = vst [vmem:[%s1232_s23 + $0xc0] sm:$0xff] %v498_v25  ;;  %v502_v39 = vadd.f32 %v1198_v0, %v368_v26  ;;  %v503_v40 = vadd.f32 %v1198_v0, %v369_v27  ;;  %v504_v41 = vadd.f32 %v1198_v0, %v370_v28  ;;  %v372_v42 = vmul.f32 %v1204_v2, %v237_v24  ;;  %v252_v5 = vld [vmem:[%s1192_s4 + $0x178] sm:$0xff]  ;;  %v253_v10 = vld [vmem:[%s1192_s4 + $0x180] sm:$0xff]  ;;  %v254_v15 = vld [vmem:[%s1192_s4 + $0x188] sm:$0xff] }
  0x5d   : > { %627 = vst [vmem:[%s1232_s23 + $0xc8] sm:$0xff] %v499_v32  ;;  %628 = vst [vmem:[%s1232_s23 + $0xd0] sm:$0xff] %v500_v33  ;;  %v505_v44 = vadd.f32 %v1198_v0, %v371_v35  ;;  %v373_v45 = vmul.f32 %v1204_v2, %v238_v29  ;;  %v374_v46 = vmul.f32 %v1204_v2, %v239_v30  ;;  %v255_v16 = vld [vmem:[%s1192_s4 + $0x190] sm:$0xff]  ;;  %v256_v17 = vld [vmem:[%s1192_s4 + $0x198] sm:$0xff] }
  0x5e   : > { %629 = vst [vmem:[%s1232_s23 + $0xd8] sm:$0xff] %v501_v34  ;;  %v375_v47 = vmul.f32 %v1204_v2, %v240_v31  ;;  %630 = vst [vmem:[%s1232_s23 + $0xe0] sm:$0xff] %v502_v39  ;;  %v506_v49 = vadd.f32 %v1198_v0, %v372_v42  ;;  %v376_v50 = vmul.f32 %v1204_v2, %v241_v36  ;;  %v257_v22 = vld [vmem:[%s1192_s4 + $0x1a0] sm:$0xff]  ;;  %v258_v23 = vld [vmem:[%s1192_s4 + $0x1a8] sm:$0xff] }
  0x5f   : > { %631 = vst [vmem:[%s1232_s23 + $0xe8] sm:$0xff] %v503_v40  ;;  %632 = vst [vmem:[%s1232_s23 + $0xf0] sm:$0xff] %v504_v41  ;;  %v377_v51 = vmul.f32 %v1204_v2, %v242_v37  ;;  %v378_v52 = vmul.f32 %v1204_v2, %v243_v38  ;;  %v507_v56 = vadd.f32 %v1198_v0, %v373_v45  ;;  %v259_v24 = vld [vmem:[%s1192_s4 + $0x1b0] sm:$0xff]  ;;  %v260_v29 = vld [vmem:[%s1192_s4 + $0x1b8] sm:$0xff] }
  0x60   : > { %633 = vst [vmem:[%s1232_s23 + $0xf8] sm:$0xff] %v505_v44  ;;  %v508_v57 = vadd.f32 %v1198_v0, %v374_v46  ;;  %v509_v58 = vadd.f32 %v1198_v0, %v375_v47  ;;  %v379_v59 = vmul.f32 %v1204_v2, %v244_v43  ;;  %634 = vst [vmem:[%s1232_s23 + $0x100] sm:$0xff] %v506_v49  ;;  %v261_v34 = vld [vmem:[%s1192_s4 + $0x1c0] sm:$0xff]  ;;  %v262_v39 = vld [vmem:[%s1192_s4 + $0x1c8] sm:$0xff] }
  0x61   : > { %v510_v63 = vadd.f32 %v1198_v0, %v376_v50  ;;  %v511_v1 = vadd.f32 %v1198_v0, %v377_v51  ;;  %v512_v3 = vadd.f32 %v1198_v0, %v378_v52  ;;  %v380_v4 = vmul.f32 %v1204_v2, %v245_v48  ;;  %635 = vst [vmem:[%s1232_s23 + $0x108] sm:$0xff] %v507_v56  ;;  %v263_v40 = vld [vmem:[%s1192_s4 + $0x1d0] sm:$0xff]  ;;  %v264_v41 = vld [vmem:[%s1192_s4 + $0x1d8] sm:$0xff]  ;;  %v265_v46 = vld [vmem:[%s1192_s4 + $0x1e0] sm:$0xff] }
  0x62   : > { %636 = vst [vmem:[%s1232_s23 + $0x110] sm:$0xff] %v508_v57  ;;  %637 = vst [vmem:[%s1232_s23 + $0x118] sm:$0xff] %v509_v58  ;;  %v513_v6 = vadd.f32 %v1198_v0, %v379_v59  ;;  %v381_v7 = vmul.f32 %v1204_v2, %v246_v53  ;;  %v382_v8 = vmul.f32 %v1204_v2, %v247_v54  ;;  %v266_v47 = vld [vmem:[%s1192_s4 + $0x1e8] sm:$0xff]  ;;  %v267_v48 = vld [vmem:[%s1192_s4 + $0x1f0] sm:$0xff] }
  0x63   : > { %v383_v9 = vmul.f32 %v1204_v2, %v248_v55  ;;  %638 = vst [vmem:[%s1232_s23 + $0x120] sm:$0xff] %v510_v63  ;;  %639 = vst [vmem:[%s1232_s23 + $0x128] sm:$0xff] %v511_v1  ;;  %v514_v11 = vadd.f32 %v1198_v0, %v380_v4  ;;  %v384_v12 = vmul.f32 %v1204_v2, %v249_v60  ;;  %v268_v53 = vld [vmem:[%s1192_s4 + $0x1f8] sm:$0xff]  ;;  %v269_v58 = vld [vmem:[%s1192_s4 + $0x200] sm:$0xff] }
  0x64   : > { %640 = vst [vmem:[%s1232_s23 + $0x130] sm:$0xff] %v512_v3  ;;  %v385_v13 = vmul.f32 %v1204_v2, %v250_v61  ;;  %v386_v14 = vmul.f32 %v1204_v2, %v251_v62  ;;  %641 = vst [vmem:[%s1232_s23 + $0x138] sm:$0xff] %v513_v6  ;;  %v515_v18 = vadd.f32 %v1198_v0, %v381_v7  ;;  %v270_v63 = vld [vmem:[%s1192_s4 + $0x208] sm:$0xff]  ;;  %v271_v1 = vld [vmem:[%s1192_s4 + $0x210] sm:$0xff] }
  0x65   : > { %v516_v19 = vadd.f32 %v1198_v0, %v382_v8  ;;  %v517_v20 = vadd.f32 %v1198_v0, %v383_v9  ;;  %v387_v21 = vmul.f32 %v1204_v2, %v252_v5  ;;  %642 = vst [vmem:[%s1232_s23 + $0x140] sm:$0xff] %v514_v11  ;;  %v518_v25 = vadd.f32 %v1198_v0, %v384_v12  ;;  %v272_v3 = vld [vmem:[%s1192_s4 + $0x218] sm:$0xff]  ;;  %v273_v8 = vld [vmem:[%s1192_s4 + $0x220] sm:$0xff]  ;;  %v274_v9 = vld [vmem:[%s1192_s4 + $0x228] sm:$0xff] }
  0x66   : > { %v519_v26 = vadd.f32 %v1198_v0, %v385_v13  ;;  %v520_v27 = vadd.f32 %v1198_v0, %v386_v14  ;;  %v388_v28 = vmul.f32 %v1204_v2, %v253_v10  ;;  %643 = vst [vmem:[%s1232_s23 + $0x148] sm:$0xff] %v515_v18  ;;  %v389_v31 = vmul.f32 %v1204_v2, %v254_v15  ;;  %v275_v10 = vld [vmem:[%s1192_s4 + $0x230] sm:$0xff]  ;;  %v276_v15 = vld [vmem:[%s1192_s4 + $0x238] sm:$0xff] }
  0x67   : > { %644 = vst [vmem:[%s1232_s23 + $0x150] sm:$0xff] %v516_v19  ;;  %645 = vst [vmem:[%s1232_s23 + $0x158] sm:$0xff] %v517_v20  ;;  %v521_v30 = vadd.f32 %v1198_v0, %v387_v21  ;;  %v390_v32 = vmul.f32 %v1204_v2, %v255_v16  ;;  %v391_v33 = vmul.f32 %v1204_v2, %v256_v17  ;;  %v277_v20 = vld [vmem:[%s1192_s4 + $0x240] sm:$0xff] }
  0x68   : > { %646 = vst [vmem:[%s1232_s23 + $0x160] sm:$0xff] %v518_v25  ;;  %647 = vst [vmem:[%s1232_s23 + $0x168] sm:$0xff] %v519_v26  ;;  %v522_v35 = vadd.f32 %v1198_v0, %v388_v28  ;;  %v392_v36 = vmul.f32 %v1204_v2, %v257_v22  ;;  %v393_v37 = vmul.f32 %v1204_v2, %v258_v23  ;;  %v278_v25 = vld [vmem:[%s1192_s4 + $0x248] sm:$0xff]  ;;  %v279_v26 = vld [vmem:[%s1192_s4 + $0x250] sm:$0xff] }
  0x69   : > { %648 = vst [vmem:[%s1232_s23 + $0x170] sm:$0xff] %v520_v27  ;;  %v394_v38 = vmul.f32 %v1204_v2, %v259_v24  ;;  %649 = vst [vmem:[%s1232_s23 + $0x178] sm:$0xff] %v521_v30  ;;  %v523_v42 = vadd.f32 %v1198_v0, %v389_v31  ;;  %v524_v43 = vadd.f32 %v1198_v0, %v390_v32  ;;  %v280_v27 = vld [vmem:[%s1192_s4 + $0x258] sm:$0xff]  ;;  %v281_v32 = vld [vmem:[%s1192_s4 + $0x260] sm:$0xff] }
  0x6a   : > { %v525_v44 = vadd.f32 %v1198_v0, %v391_v33  ;;  %v395_v45 = vmul.f32 %v1204_v2, %v260_v29  ;;  %650 = vst [vmem:[%s1232_s23 + $0x180] sm:$0xff] %v522_v35  ;;  %v526_v49 = vadd.f32 %v1198_v0, %v392_v36  ;;  %v527_v50 = vadd.f32 %v1198_v0, %v393_v37  ;;  %v282_v33 = vld [vmem:[%s1192_s4 + $0x268] sm:$0xff] }
  0x6b   : > { %v528_v51 = vadd.f32 %v1198_v0, %v394_v38  ;;  %v396_v52 = vmul.f32 %v1204_v2, %v261_v34  ;;  %651 = vst [vmem:[%s1232_s23 + $0x188] sm:$0xff] %v523_v42  ;;  %652 = vst [vmem:[%s1232_s23 + $0x190] sm:$0xff] %v524_v43  ;;  %v397_v55 = vmul.f32 %v1204_v2, %v262_v39  ;;  %v283_v34 = vld [vmem:[%s1192_s4 + $0x270] sm:$0xff]  ;;  %v284_v39 = vld [vmem:[%s1192_s4 + $0x278] sm:$0xff] }
  0x6c   : > { %653 = vst [vmem:[%s1232_s23 + $0x198] sm:$0xff] %v525_v44  ;;  %v529_v54 = vadd.f32 %v1198_v0, %v395_v45  ;;  %v398_v56 = vmul.f32 %v1204_v2, %v263_v40  ;;  %v399_v57 = vmul.f32 %v1204_v2, %v264_v41  ;;  %654 = vst [vmem:[%s1232_s23 + $0x1a0] sm:$0xff] %v526_v49  ;;  %v285_v44 = vld [vmem:[%s1192_s4 + $0x280] sm:$0xff]  ;;  %v286_v49 = vld [vmem:[%s1192_s4 + $0x288] sm:$0xff] }
  0x6d   : > { %655 = vst [vmem:[%s1232_s23 + $0x1a8] sm:$0xff] %v527_v50  ;;  %656 = vst [vmem:[%s1232_s23 + $0x1b0] sm:$0xff] %v528_v51  ;;  %v530_v59 = vadd.f32 %v1198_v0, %v396_v52  ;;  %v400_v60 = vmul.f32 %v1204_v2, %v265_v46  ;;  %v401_v61 = vmul.f32 %v1204_v2, %v266_v47  ;;  %v287_v50 = vld [vmem:[%s1192_s4 + $0x290] sm:$0xff]  ;;  %v288_v51 = vld [vmem:[%s1192_s4 + $0x298] sm:$0xff] }
  0x6e   : > { %v402_v62 = vmul.f32 %v1204_v2, %v267_v48  ;;  %657 = vst [vmem:[%s1232_s23 + $0x1b8] sm:$0xff] %v529_v54  ;;  %v531_v4 = vadd.f32 %v1198_v0, %v397_v55  ;;  %v532_v5 = vadd.f32 %v1198_v0, %v398_v56  ;;  %v533_v6 = vadd.f32 %v1198_v0, %v399_v57  ;;  %v289_v56 = vld [vmem:[%s1192_s4 + $0x2a0] sm:$0xff]  ;;  %v290_v57 = vld [vmem:[%s1192_s4 + $0x2a8] sm:$0xff] }
  0x6f   : > { %v403_v7 = vmul.f32 %v1204_v2, %v268_v53  ;;  %658 = vst [vmem:[%s1232_s23 + $0x1c0] sm:$0xff] %v530_v59  ;;  %v534_v11 = vadd.f32 %v1198_v0, %v400_v60  ;;  %v535_v12 = vadd.f32 %v1198_v0, %v401_v61  ;;  %v404_v14 = vmul.f32 %v1204_v2, %v269_v58  ;;  %v291_v58 = vld [vmem:[%s1192_s4 + $0x2b0] sm:$0xff] }
  0x70   : > { %v536_v13 = vadd.f32 %v1198_v0, %v402_v62  ;;  %659 = vst [vmem:[%s1232_s23 + $0x1c8] sm:$0xff] %v531_v4  ;;  %660 = vst [vmem:[%s1232_s23 + $0x1d0] sm:$0xff] %v532_v5  ;;  %v405_v17 = vmul.f32 %v1204_v2, %v270_v63  ;;  %v406_v18 = vmul.f32 %v1204_v2, %v271_v1  ;;  %v292_v63 = vld [vmem:[%s1192_s4 + $0x2b8] sm:$0xff] }
  0x71   : > { %661 = vst [vmem:[%s1232_s23 + $0x1d8] sm:$0xff] %v533_v6  ;;  %v537_v16 = vadd.f32 %v1198_v0, %v403_v7  ;;  %v407_v19 = vmul.f32 %v1204_v2, %v272_v3  ;;  %662 = vst [vmem:[%s1232_s23 + $0x1e0] sm:$0xff] %v534_v11  ;;  %v538_v21 = vadd.f32 %v1198_v0, %v404_v14  ;;  %v293_v6 = vld [vmem:[%s1192_s4 + $0x2c0] sm:$0xff]  ;;  %v294_v11 = vld [vmem:[%s1192_s4 + $0x2c8] sm:$0xff] }
  0x72   : > { %663 = vst [vmem:[%s1232_s23 + $0x1e8] sm:$0xff] %v535_v12  ;;  %664 = vst [vmem:[%s1232_s23 + $0x1f0] sm:$0xff] %v536_v13  ;;  %v408_v22 = vmul.f32 %v1204_v2, %v273_v8  ;;  %v409_v23 = vmul.f32 %v1204_v2, %v274_v9  ;;  %v410_v24 = vmul.f32 %v1204_v2, %v275_v10  ;;  %v295_v12 = vld [vmem:[%s1192_s4 + $0x2d0] sm:$0xff]  ;;  %v296_v13 = vld [vmem:[%s1192_s4 + $0x2d8] sm:$0xff] }
  0x73   : > { %665 = vst [vmem:[%s1232_s23 + $0x1f8] sm:$0xff] %v537_v16  ;;  %v539_v28 = vadd.f32 %v1198_v0, %v405_v17  ;;  %v540_v29 = vadd.f32 %v1198_v0, %v406_v18  ;;  %v541_v30 = vadd.f32 %v1198_v0, %v407_v19  ;;  %v411_v31 = vmul.f32 %v1204_v2, %v276_v15  ;;  %v297_v18 = vld [vmem:[%s1192_s4 + $0x2e0] sm:$0xff]  ;;  %v298_v19 = vld [vmem:[%s1192_s4 + $0x2e8] sm:$0xff] }
  0x74   : > { %666 = vst [vmem:[%s1232_s23 + $0x200] sm:$0xff] %v538_v21  ;;  %v542_v35 = vadd.f32 %v1198_v0, %v408_v22  ;;  %v543_v36 = vadd.f32 %v1198_v0, %v409_v23  ;;  %v544_v37 = vadd.f32 %v1198_v0, %v410_v24  ;;  %v412_v38 = vmul.f32 %v1204_v2, %v277_v20  ;;  %v299_v20 = vld [vmem:[%s1192_s4 + $0x2f0] sm:$0xff] }
  0x75   : > { %667 = vst [vmem:[%s1232_s23 + $0x208] sm:$0xff] %v539_v28  ;;  %668 = vst [vmem:[%s1232_s23 + $0x210] sm:$0xff] %v540_v29  ;;  %v545_v40 = vadd.f32 %v1198_v0, %v411_v31  ;;  %v413_v41 = vmul.f32 %v1204_v2, %v278_v25  ;;  %v414_v42 = vmul.f32 %v1204_v2, %v279_v26  ;;  %v300_v25 = vld [vmem:[%s1192_s4 + $0x2f8] sm:$0xff] }
  0x76   : > { %669 = vst [vmem:[%s1232_s23 + $0x218] sm:$0xff] %v541_v30  ;;  %v415_v43 = vmul.f32 %v1204_v2, %v280_v27  ;;  %670 = vst [vmem:[%s1232_s23 + $0x220] sm:$0xff] %v542_v35  ;;  %v546_v45 = vadd.f32 %v1198_v0, %v412_v38  ;;  %v416_v46 = vmul.f32 %v1204_v2, %v281_v32  ;;  %v301_v30 = vld [vmem:[%s1192_s4 + $0x300] sm:$0xff]  ;;  %v302_v35 = vld [vmem:[%s1192_s4 + $0x308] sm:$0xff] }
  0x77   : > { %671 = vst [vmem:[%s1232_s23 + $0x228] sm:$0xff] %v543_v36  ;;  %672 = vst [vmem:[%s1232_s23 + $0x230] sm:$0xff] %v544_v37  ;;  %v417_v47 = vmul.f32 %v1204_v2, %v282_v33  ;;  %v418_v48 = vmul.f32 %v1204_v2, %v283_v34  ;;  %v547_v52 = vadd.f32 %v1198_v0, %v413_v41  ;;  %v303_v36 = vld [vmem:[%s1192_s4 + $0x310] sm:$0xff]  ;;  %v304_v37 = vld [vmem:[%s1192_s4 + $0x318] sm:$0xff] }
  0x78   : > { %673 = vst [vmem:[%s1232_s23 + $0x238] sm:$0xff] %v545_v40  ;;  %v548_v53 = vadd.f32 %v1198_v0, %v414_v42  ;;  %v549_v54 = vadd.f32 %v1198_v0, %v415_v43  ;;  %v419_v55 = vmul.f32 %v1204_v2, %v284_v39  ;;  %674 = vst [vmem:[%s1232_s23 + $0x240] sm:$0xff] %v546_v45  ;;  %v305_v42 = vld [vmem:[%s1192_s4 + $0x320] sm:$0xff]  ;;  %v306_v43 = vld [vmem:[%s1192_s4 + $0x328] sm:$0xff] }
  0x79   : > { %v550_v59 = vadd.f32 %v1198_v0, %v416_v46  ;;  %v551_v60 = vadd.f32 %v1198_v0, %v417_v47  ;;  %v552_v61 = vadd.f32 %v1198_v0, %v418_v48  ;;  %v420_v62 = vmul.f32 %v1204_v2, %v285_v44  ;;  %675 = vst [vmem:[%s1232_s23 + $0x248] sm:$0xff] %v547_v52  ;;  %v307_v44 = vld [vmem:[%s1192_s4 + $0x330] sm:$0xff] }
  0x7a   : > { %676 = vst [vmem:[%s1232_s23 + $0x250] sm:$0xff] %v548_v53  ;;  %677 = vst [vmem:[%s1232_s23 + $0x258] sm:$0xff] %v549_v54  ;;  %v553_v1 = vadd.f32 %v1198_v0, %v419_v55  ;;  %v421_v3 = vmul.f32 %v1204_v2, %v286_v49  ;;  %v422_v4 = vmul.f32 %v1204_v2, %v287_v50  ;;  %v308_v49 = vld [vmem:[%s1192_s4 + $0x338] sm:$0xff]  ;;  %v309_v54 = vld [vmem:[%s1192_s4 + $0x340] sm:$0xff] }
  0x7b   : > { %v423_v5 = vmul.f32 %v1204_v2, %v288_v51  ;;  %678 = vst [vmem:[%s1232_s23 + $0x260] sm:$0xff] %v550_v59  ;;  %679 = vst [vmem:[%s1232_s23 + $0x268] sm:$0xff] %v551_v60  ;;  %v554_v7 = vadd.f32 %v1198_v0, %v420_v62  ;;  %v424_v8 = vmul.f32 %v1204_v2, %v289_v56  ;;  %v310_v59 = vld [vmem:[%s1192_s4 + $0x348] sm:$0xff]  ;;  %v311_v60 = vld [vmem:[%s1192_s4 + $0x350] sm:$0xff] }
  0x7c   : > { %680 = vst [vmem:[%s1232_s23 + $0x270] sm:$0xff] %v552_v61  ;;  %v425_v9 = vmul.f32 %v1204_v2, %v290_v57  ;;  %v426_v10 = vmul.f32 %v1204_v2, %v291_v58  ;;  %681 = vst [vmem:[%s1232_s23 + $0x278] sm:$0xff] %v553_v1  ;;  %v555_v14 = vadd.f32 %v1198_v0, %v421_v3  ;;  %v312_v61 = vld [vmem:[%s1192_s4 + $0x358] sm:$0xff] }
  0x7d   : > { %v556_v15 = vadd.f32 %v1198_v0, %v422_v4  ;;  %v557_v16 = vadd.f32 %v1198_v0, %v423_v5  ;;  %v427_v17 = vmul.f32 %v1204_v2, %v292_v63  ;;  %682 = vst [vmem:[%s1232_s23 + $0x280] sm:$0xff] %v554_v7  ;;  %v558_v21 = vadd.f32 %v1198_v0, %v424_v8  ;;  %v313_v4 = vld [vmem:[%s1192_s4 + $0x360] sm:$0xff]  ;;  %v314_v5 = vld [vmem:[%s1192_s4 + $0x368] sm:$0xff] }
  0x7e   : > { %v559_v22 = vadd.f32 %v1198_v0, %v425_v9  ;;  %v560_v23 = vadd.f32 %v1198_v0, %v426_v10  ;;  %v428_v24 = vmul.f32 %v1204_v2, %v293_v6  ;;  %683 = vst [vmem:[%s1232_s23 + $0x288] sm:$0xff] %v555_v14  ;;  %v429_v27 = vmul.f32 %v1204_v2, %v294_v11  ;;  %v315_v6 = vld [vmem:[%s1192_s4 + $0x370] sm:$0xff]  ;;  %v316_v11 = vld [vmem:[%s1192_s4 + $0x378] sm:$0xff] }
  0x7f   : > { %684 = vst [vmem:[%s1232_s23 + $0x290] sm:$0xff] %v556_v15  ;;  %685 = vst [vmem:[%s1232_s23 + $0x298] sm:$0xff] %v557_v16  ;;  %v561_v26 = vadd.f32 %v1198_v0, %v427_v17  ;;  %v430_v28 = vmul.f32 %v1204_v2, %v295_v12  ;;  %v431_v29 = vmul.f32 %v1204_v2, %v296_v13  ;;  %v317_v16 = vld [vmem:[%s1192_s4 + $0x380] sm:$0xff] }
  0x80   : > { %686 = vst [vmem:[%s1232_s23 + $0x2a0] sm:$0xff] %v558_v21  ;;  %687 = vst [vmem:[%s1232_s23 + $0x2a8] sm:$0xff] %v559_v22  ;;  %v562_v31 = vadd.f32 %v1198_v0, %v428_v24  ;;  %v432_v32 = vmul.f32 %v1204_v2, %v297_v18  ;;  %v433_v33 = vmul.f32 %v1204_v2, %v298_v19  ;;  %v318_v21 = vld [vmem:[%s1192_s4 + $0x388] sm:$0xff]  ;;  %v319_v22 = vld [vmem:[%s1192_s4 + $0x390] sm:$0xff] }
  0x81   : > { %688 = vst [vmem:[%s1232_s23 + $0x2b0] sm:$0xff] %v560_v23  ;;  %v434_v34 = vmul.f32 %v1204_v2, %v299_v20  ;;  %689 = vst [vmem:[%s1232_s23 + $0x2b8] sm:$0xff] %v561_v26  ;;  %v563_v38 = vadd.f32 %v1198_v0, %v429_v27  ;;  %v564_v39 = vadd.f32 %v1198_v0, %v430_v28  ;;  %v320_v23 = vld [vmem:[%s1192_s4 + $0x398] sm:$0xff]  ;;  %v321_v28 = vld [vmem:[%s1192_s4 + $0x3a0] sm:$0xff] }
  0x82   : > { %v565_v40 = vadd.f32 %v1198_v0, %v431_v29  ;;  %v435_v41 = vmul.f32 %v1204_v2, %v300_v25  ;;  %690 = vst [vmem:[%s1232_s23 + $0x2c0] sm:$0xff] %v562_v31  ;;  %v566_v45 = vadd.f32 %v1198_v0, %v432_v32  ;;  %v567_v46 = vadd.f32 %v1198_v0, %v433_v33  ;;  %v322_v29 = vld [vmem:[%s1192_s4 + $0x3a8] sm:$0xff] }
  0x83   : > { %v568_v47 = vadd.f32 %v1198_v0, %v434_v34  ;;  %v436_v48 = vmul.f32 %v1204_v2, %v301_v30  ;;  %691 = vst [vmem:[%s1232_s23 + $0x2c8] sm:$0xff] %v563_v38  ;;  %692 = vst [vmem:[%s1232_s23 + $0x2d0] sm:$0xff] %v564_v39  ;;  %v437_v51 = vmul.f32 %v1204_v2, %v302_v35  ;;  %v323_v30 = vld [vmem:[%s1192_s4 + $0x3b0] sm:$0xff]  ;;  %v324_v35 = vld [vmem:[%s1192_s4 + $0x3b8] sm:$0xff] }
  0x84   : > { %693 = vst [vmem:[%s1232_s23 + $0x2d8] sm:$0xff] %v565_v40  ;;  %v569_v50 = vadd.f32 %v1198_v0, %v435_v41  ;;  %v438_v52 = vmul.f32 %v1204_v2, %v303_v36  ;;  %v439_v53 = vmul.f32 %v1204_v2, %v304_v37  ;;  %694 = vst [vmem:[%s1232_s23 + $0x2e0] sm:$0xff] %v566_v45  ;;  %v325_v40 = vld [vmem:[%s1192_s4 + $0x3c0] sm:$0xff]  ;;  %v326_v45 = vld [vmem:[%s1192_s4 + $0x3c8] sm:$0xff] }
  0x85   : > { %695 = vst [vmem:[%s1232_s23 + $0x2e8] sm:$0xff] %v567_v46  ;;  %696 = vst [vmem:[%s1232_s23 + $0x2f0] sm:$0xff] %v568_v47  ;;  %v570_v55 = vadd.f32 %v1198_v0, %v436_v48  ;;  %v440_v56 = vmul.f32 %v1204_v2, %v305_v42  ;;  %v441_v57 = vmul.f32 %v1204_v2, %v306_v43  ;;  %v327_v46 = vld [vmem:[%s1192_s4 + $0x3d0] sm:$0xff]  ;;  %v328_v47 = vld [vmem:[%s1192_s4 + $0x3d8] sm:$0xff] }
  0x86   : > { %v442_v58 = vmul.f32 %v1204_v2, %v307_v44  ;;  %697 = vst [vmem:[%s1232_s23 + $0x2f8] sm:$0xff] %v569_v50  ;;  %v571_v62 = vadd.f32 %v1198_v0, %v437_v51  ;;  %v572_v63 = vadd.f32 %v1198_v0, %v438_v52  ;;  %v573_v1 = vadd.f32 %v1198_v0, %v439_v53  ;;  %v329_v52 = vld [vmem:[%s1192_s4 + $0x3e0] sm:$0xff]  ;;  %v330_v53 = vld [vmem:[%s1192_s4 + $0x3e8] sm:$0xff] }
  0x87   : > { %v443_v3 = vmul.f32 %v1204_v2, %v308_v49  ;;  %698 = vst [vmem:[%s1232_s23 + $0x300] sm:$0xff] %v570_v55  ;;  %v574_v7 = vadd.f32 %v1198_v0, %v440_v56  ;;  %v575_v8 = vadd.f32 %v1198_v0, %v441_v57  ;;  %v444_v10 = vmul.f32 %v1204_v2, %v309_v54  ;;  %v331_v54 = vld [vmem:[%s1192_s4 + $0x3f0] sm:$0xff] }
  0x88   : > { %v576_v9 = vadd.f32 %v1198_v0, %v442_v58  ;;  %699 = vst [vmem:[%s1232_s23 + $0x308] sm:$0xff] %v571_v62  ;;  %700 = vst [vmem:[%s1232_s23 + $0x310] sm:$0xff] %v572_v63  ;;  %v445_v13 = vmul.f32 %v1204_v2, %v310_v59  ;;  %v446_v14 = vmul.f32 %v1204_v2, %v311_v60  ;;  %v332_v59 = vld [vmem:[%s1192_s4 + $0x3f8] sm:$0xff] }
  0x89   : > { %701 = vst [vmem:[%s1232_s23 + $0x318] sm:$0xff] %v573_v1  ;;  %v577_v12 = vadd.f32 %v1198_v0, %v443_v3  ;;  %v447_v15 = vmul.f32 %v1204_v2, %v312_v61  ;;  %702 = vst [vmem:[%s1232_s23 + $0x320] sm:$0xff] %v574_v7  ;;  %v578_v17 = vadd.f32 %v1198_v0, %v444_v10 }
  0x8a   : > { %703 = vst [vmem:[%s1232_s23 + $0x328] sm:$0xff] %v575_v8  ;;  %704 = vst [vmem:[%s1232_s23 + $0x330] sm:$0xff] %v576_v9  ;;  %v448_v18 = vmul.f32 %v1204_v2, %v313_v4  ;;  %v449_v19 = vmul.f32 %v1204_v2, %v314_v5  ;;  %v450_v20 = vmul.f32 %v1204_v2, %v315_v6 }
  0x8b   : > { %705 = vst [vmem:[%s1232_s23 + $0x338] sm:$0xff] %v577_v12  ;;  %v579_v24 = vadd.f32 %v1198_v0, %v445_v13  ;;  %v580_v25 = vadd.f32 %v1198_v0, %v446_v14  ;;  %v581_v26 = vadd.f32 %v1198_v0, %v447_v15  ;;  %v451_v27 = vmul.f32 %v1204_v2, %v316_v11 }
  0x8c   : > { %706 = vst [vmem:[%s1232_s23 + $0x340] sm:$0xff] %v578_v17  ;;  %v582_v31 = vadd.f32 %v1198_v0, %v448_v18  ;;  %v583_v32 = vadd.f32 %v1198_v0, %v449_v19  ;;  %v584_v33 = vadd.f32 %v1198_v0, %v450_v20  ;;  %v452_v34 = vmul.f32 %v1204_v2, %v317_v16 }
  0x8d   : > { %707 = vst [vmem:[%s1232_s23 + $0x348] sm:$0xff] %v579_v24  ;;  %708 = vst [vmem:[%s1232_s23 + $0x350] sm:$0xff] %v580_v25  ;;  %v585_v36 = vadd.f32 %v1198_v0, %v451_v27  ;;  %v453_v37 = vmul.f32 %v1204_v2, %v318_v21  ;;  %v454_v38 = vmul.f32 %v1204_v2, %v319_v22 }
  0x8e   : > { %709 = vst [vmem:[%s1232_s23 + $0x358] sm:$0xff] %v581_v26  ;;  %v455_v39 = vmul.f32 %v1204_v2, %v320_v23  ;;  %710 = vst [vmem:[%s1232_s23 + $0x360] sm:$0xff] %v582_v31  ;;  %v586_v41 = vadd.f32 %v1198_v0, %v452_v34  ;;  %v456_v42 = vmul.f32 %v1204_v2, %v321_v28 }
  0x8f   : > { %711 = vst [vmem:[%s1232_s23 + $0x368] sm:$0xff] %v583_v32  ;;  %712 = vst [vmem:[%s1232_s23 + $0x370] sm:$0xff] %v584_v33  ;;  %v457_v43 = vmul.f32 %v1204_v2, %v322_v29  ;;  %v458_v44 = vmul.f32 %v1204_v2, %v323_v30  ;;  %v587_v48 = vadd.f32 %v1198_v0, %v453_v37 }
  0x90   : > { %713 = vst [vmem:[%s1232_s23 + $0x378] sm:$0xff] %v585_v36  ;;  %v588_v49 = vadd.f32 %v1198_v0, %v454_v38  ;;  %v589_v50 = vadd.f32 %v1198_v0, %v455_v39  ;;  %v459_v51 = vmul.f32 %v1204_v2, %v324_v35  ;;  %714 = vst [vmem:[%s1232_s23 + $0x380] sm:$0xff] %v586_v41 }
  0x91   : > { %v590_v55 = vadd.f32 %v1198_v0, %v456_v42  ;;  %v591_v56 = vadd.f32 %v1198_v0, %v457_v43  ;;  %v592_v57 = vadd.f32 %v1198_v0, %v458_v44  ;;  %v460_v58 = vmul.f32 %v1204_v2, %v325_v40  ;;  %715 = vst [vmem:[%s1232_s23 + $0x388] sm:$0xff] %v587_v48 }
  0x92   : > { %716 = vst [vmem:[%s1232_s23 + $0x390] sm:$0xff] %v588_v49  ;;  %717 = vst [vmem:[%s1232_s23 + $0x398] sm:$0xff] %v589_v50  ;;  %v593_v60 = vadd.f32 %v1198_v0, %v459_v51  ;;  %v461_v61 = vmul.f32 %v1204_v2, %v326_v45  ;;  %v462_v62 = vmul.f32 %v1204_v2, %v327_v46 }
  0x93   : > { %v463_v63 = vmul.f32 %v1204_v2, %v328_v47  ;;  %718 = vst [vmem:[%s1232_s23 + $0x3a0] sm:$0xff] %v590_v55  ;;  %719 = vst [vmem:[%s1232_s23 + $0x3a8] sm:$0xff] %v591_v56  ;;  %v594_v1 = vadd.f32 %v1198_v0, %v460_v58  ;;  %v464_v3 = vmul.f32 %v1204_v2, %v329_v52 }
  0x94   : > { %720 = vst [vmem:[%s1232_s23 + $0x3b0] sm:$0xff] %v592_v57  ;;  %v465_v4 = vmul.f32 %v1204_v2, %v330_v53  ;;  %v466_v5 = vmul.f32 %v1204_v2, %v331_v54  ;;  %721 = vst [vmem:[%s1232_s23 + $0x3b8] sm:$0xff] %v593_v60  ;;  %v595_v6 = vadd.f32 %v1198_v0, %v461_v61 }
  0x95   : > { %v596_v7 = vadd.f32 %v1198_v0, %v462_v62  ;;  %v597_v8 = vadd.f32 %v1198_v0, %v463_v63  ;;  %v467_v9 = vmul.f32 %v1204_v2, %v332_v59  ;;  %722 = vst [vmem:[%s1232_s23 + $0x3c0] sm:$0xff] %v594_v1  ;;  %v598_v10 = vadd.f32 %v1198_v0, %v464_v3  ;;  %v910_v2 = vld [vmem:[#allocation2] ss:$0 sm:$0xff] }
  0x96   : > { %v599_v11 = vadd.f32 %v1198_v0, %v465_v4  ;;  %v600_v12 = vadd.f32 %v1198_v0, %v466_v5  ;;  %723 = vst [vmem:[%s1232_s23 + $0x3c8] sm:$0xff] %v595_v6 }
  0x97   : > { %724 = vst [vmem:[%s1232_s23 + $0x3d0] sm:$0xff] %v596_v7  ;;  %725 = vst [vmem:[%s1232_s23 + $0x3d8] sm:$0xff] %v597_v8  ;;  %v601_v13 = vadd.f32 %v910_v2, %v467_v9 }
  0x98   : > { %726 = vst [vmem:[%s1232_s23 + $0x3e0] sm:$0xff] %v598_v10  ;;  %727 = vst [vmem:[%s1232_s23 + $0x3e8] sm:$0xff] %v599_v11 }
  0x99   : > { %728 = vst [vmem:[%s1232_s23 + $0x3f0] sm:$0xff] %v600_v12  ;;  %729 = vst [vmem:[%s1232_s23 + $0x3f8] sm:$0xff] %v601_v13 }
  0x9a   : > { %978 = shalt.err (!%p975_p0)
}
  0x9b   : > { %s979_s19 = scalar_lea.hbm %s1718_s7, 16384  ;;  %s983_s5 = scalar_lea.hbm %s1773_s3, 32768 }
  0x9c   : > { %p980_p4 = scmp.ne.s32.totalorder %s1718_s7, %s979_s19  ;;  %p984_p12 = scmp.lt.s32.totalorder %s1718_s7, %s1773_s3 }
  0x9d   : > { %p985_p1 = scmp.lt.s32.totalorder %s983_s5, %s979_s19 }
  0x9e   : > { %p981_p11 = pnand %p980_p4, %p1790_p3 }
  0x9f   : > { %p986_p6 = por %p985_p1, %p984_p12 }
  0xa0   : > { %p982_p5 = pneg %p981_p11 }
  0xa2   : > { %p987_p13 = pnand %p986_p6, %p982_p5 }
  0xa4   : > { %990 = shalt.err (!%p987_p13)
}
  0xa5   : > { %s1040_s17 = smov 128   ;;  %s1041_s23 = smov 8  }
  0xa6   : > { %855 = dma.vmem_to_hbm [thread:$0]  (%p1790_p3), %s1720_s27, 16384, %s1718_s7, %s731_s8, %s1040_s17, %s1040_s17, %s1041_s23  }
  0xa7 PF: > { %s759_s22 = sand.u32 1, %s1021_s12   ;;  %p1791_p7 = scmp.ne.s32.totalorder %s1781_s25, 0 }
  0xa8   : > { %p1792_p8 = scmp.ge.s32.totalorder %s1033_s15, 2  ;;  %s760_s16 = scalar_lea.sflag [#allocation4], %s759_s22 }
  0xaa   : > { %p866_p9 = pnand %p1792_p8, %p1791_p7 }
  0xac   : > { %p867_p10 = pneg %p866_p9 }
  0xae   : > { %1016 = dma.done.wait (%p867_p10), %s760_s16, 16384  }
  0xaf   : > { %1018 = vsyncadd (%p867_p10), %s760_s16, 4294950912  ;;  %p17_p2 = scmp.ge.s32.totalorder %s1087_s18, 4   ;;  %s1793_s12 = smov %s1025_s13 }
  0xb0   : > { %s1794_s13 = smov %s1029_s14  ;;  %s1795_s14 = smov %s1099_s21 }
  0xb1   : > { %s1796_s15 = smov %s1087_s18  ;;  %19 = sbr.rel (!%p17_p2) target bundleno = 6 (0x6), region = 82 }
  0xb6   :  { %765 = vsyncpa [#allocation3], 1 }
  0xb7   :  { %767 = vsyncpa [#allocation3 + $0x1], 1 }
  0xb8   :  { %768 = vsyncpa [#allocation6], 1 }
  0xb9   :  { %770 = vsyncpa [#allocation6 + $0x1], 1 }
  0xba   :  { %771 = vsyncpa [#allocation4], 1 }
  0xbb   :  { %773 = vsyncpa [#allocation4 + $0x1], 1 }

</bundles_post_ra>
